<compile_context>
chip_gen: v7x
topology: tpu7x:2x2x1
jax: 0.10.0
libtpu: 0.0.40
codegen_flags: <defaults>
</compile_context>

<pallas_src>
import jax
import jax.numpy as jnp
from jax.experimental import pallas as pl
from jax.experimental.pallas import tpu as pltpu

_LANES = 128
_FAST_PATH_ROWS = 64  # N <= 64*128 = 8192 -> skip pallas_call entirely


def _round_up(n, m):
    return -(-n // m) * m


def _feature_kernel(xs_ref, o_ref):
    # xs_ref: (2, br, 128) stacked [x1; x2] tile (lane-dense); o_ref: (br, 128).
    x1 = xs_ref[0]
    x2 = xs_ref[1]
    o_ref[...] = (1.0 - x1 * x1) * (1.0 - x2 * x2)


def _choose_tiling(rows, block_rows, sub):
    """Pick (block_rows, grid, rows_padded): block multiple of `sub`, even grid."""
    br = max(sub, min(_round_up(block_rows, sub), _round_up(rows, sub)))
    g = -(-rows // br)
    if g > 1 and g % 2:
        g += 1  # even grid -> clean 2-TensorCore split on v7x; harmless elsewhere
    br = _round_up(-(-rows // g), sub)
    return br, g, g * br


def my_feature(x, *, block_rows=2048):
    """Pallas equivalent of myFeature.forward.

    x: (N, D) float array, D >= 2, column 0 = 'x1', column 1 = 'x2'.
    returns: (N, 1) array of the same dtype (the 'k0' feature).
    """
    N, D = x.shape
    assert D >= 2, "need at least the two spatial coordinates x1, x2"
    dtype = x.dtype

    rows = -(-N // _LANES)  # number of 128-wide lane rows needed for N points

    # Small-N fast path: a standalone pallas_call launch would dominate.
    if rows <= _FAST_PATH_ROWS:
        return (1.0 - x[:, 0:1] * x[:, 0:1]) * (1.0 - x[:, 1:2] * x[:, 1:2])

    # Sublane multiple for the second-to-last block dim, per dtype packing.
    itemsize = jnp.dtype(dtype).itemsize
    sub = {4: 8, 2: 16, 1: 32}.get(itemsize, 8)

    br, grid, rows_padded = _choose_tiling(rows, block_rows, sub)
    n_pad = rows_padded * _LANES - N

    # One stacked, lane-dense operand: (2, rows_padded, 128) = [x1; x2].
    # With allow_input_fusion XLA may fold this producer into the input DMA.
    x12 = jnp.pad(x[:, :2].T, ((0, 0), (0, n_pad)))
    xs = x12.reshape(2, rows_padded, _LANES)

    out2d = pl.pallas_call(
        _feature_kernel,
        out_shape=jax.ShapeDtypeStruct((rows_padded, _LANES), dtype),
        grid_spec=pl.GridSpec(
            grid=(grid,),
            in_specs=[pl.BlockSpec((2, br, _LANES), lambda i: (0, i, 0))],
            out_specs=pl.BlockSpec((br, _LANES), lambda i: (i, 0)),
        ),
        compiler_params=pltpu.CompilerParams(
            dimension_semantics=("parallel",),
            allow_input_fusion=[True],
        ),
    )(xs)

    # Drop padding and restore the (N, 1) column shape (see TODO above).
    return out2d.reshape(-1)[:N].reshape(N, 1)


def _reference(x):
    return (1.0 - x[:, 0:1] ** 2) * (1.0 - x[:, 1:2] ** 2)


if __name__ == "__main__":
    key = jax.random.PRNGKey(0)

    # Test 1: small N -> fast path (no pallas_call), N not a multiple of 128.
    N1, D1 = 1000, 3  # columns: x1, x2, mu (mu ignored by the feature)
    x_small = jax.random.uniform(
        key, (N1, D1), dtype=jnp.float32, minval=-1.0, maxval=1.0
    )
    out1 = jax.block_until_ready(my_feature(x_small))
    assert out1.shape == (N1, 1)
    assert jnp.allclose(out1, _reference(x_small), atol=1e-6, rtol=1e-6)

    # Test 2: mid-size N -> single-tile pallas path, exercises lane padding.
    N2, D2 = 20000, 3
    x_mid = jax.random.uniform(
        jax.random.PRNGKey(1), (N2, D2), dtype=jnp.float32, minval=-1.0, maxval=1.0
    )
    out2 = jax.block_until_ready(my_feature(x_mid))
    assert out2.shape == (N2, 1)
    assert jnp.allclose(out2, _reference(x_mid), atol=1e-6, rtol=1e-6)

    # Test 3: larger N with a small block_rows override -> multi-step grid,
    # exercises the even-grid (v7x 2-TC) tiling logic.
    N3, D3 = 131149, 3
    x_big = jax.random.uniform(
        jax.random.PRNGKey(2), (N3, D3), dtype=jnp.float32, minval=-1.0, maxval=1.0
    )
    out3 = jax.block_until_ready(my_feature(x_big, block_rows=256))
    assert out3.shape == (N3, 1)
    assert jnp.allclose(out3, _reference(x_big), atol=1e-6, rtol=1e-6)

    # Test 4: same large N at the default 2048-row tile.
    out4 = jax.block_until_ready(my_feature(x_big))
    assert out4.shape == (N3, 1)
    assert jnp.allclose(out4, _reference(x_big), atol=1e-6, rtol=1e-6)

    print("KERNEL_OK")
</pallas_src>

<mosaic_0001>
module attributes {stable_mosaic.version = 11 : i64} {
  func.func @_feature_kernel(%arg0: i32, %arg1: memref<2x160x128xf32, #tpu.memory_space<vmem>>, %arg2: memref<160x128xf32, #tpu.memory_space<vmem>>) attributes {dimension_semantics = [#tpu.dimension_semantics<parallel>], iteration_bounds = array<i64: 1>, scalar_prefetch = 0 : i64, scratch_operands = 0 : i64, tpu.core_type = #tpu.core_type<tc>, window_params = [{transform_indices = @transform_0, window_bounds = array<i64: 2, 160, 128>}, {transform_indices = @transform_1, window_bounds = array<i64: 160, 128>}]} {
    %c0 = arith.constant 0 : index
    %c0_0 = arith.constant 0 : index
    %c0_1 = arith.constant 0 : index
    %0 = vector.load %arg1[%c0, %c0_0, %c0_1] : memref<2x160x128xf32, #tpu.memory_space<vmem>>, vector<1x160x128xf32>
    %1 = vector.shape_cast %0 : vector<1x160x128xf32> to vector<160x128xf32>
    %c1 = arith.constant 1 : index
    %c0_2 = arith.constant 0 : index
    %c0_3 = arith.constant 0 : index
    %2 = vector.load %arg1[%c1, %c0_2, %c0_3] : memref<2x160x128xf32, #tpu.memory_space<vmem>>, vector<1x160x128xf32>
    %3 = vector.shape_cast %2 : vector<1x160x128xf32> to vector<160x128xf32>
    %4 = arith.mulf %1, %1 : vector<160x128xf32>
    %cst = arith.constant 1.000000e+00 : f32
    %5 = vector.broadcast %cst : f32 to vector<160x128xf32>
    %6 = arith.subf %5, %4 : vector<160x128xf32>
    %7 = arith.mulf %3, %3 : vector<160x128xf32>
    %cst_4 = arith.constant 1.000000e+00 : f32
    %8 = vector.broadcast %cst_4 : f32 to vector<160x128xf32>
    %9 = arith.subf %8, %7 : vector<160x128xf32>
    %10 = arith.mulf %6, %9 : vector<160x128xf32>
    %c0_5 = arith.constant 0 : index
    %c0_6 = arith.constant 0 : index
    %11 = vector.load %arg2[%c0_5, %c0_6] : memref<160x128xf32, #tpu.memory_space<vmem>>, vector<160x128xf32>
    tpu.vector_store %arg2[%c0_5, %c0_6], %10 {strides = array<i32>} : memref<160x128xf32, #tpu.memory_space<vmem>>, vector<160x128xf32>,
    return
  }
  func.func @transform_0(%arg0: i32) -> (i32, i32, i32) {
    %c0_i32 = arith.constant 0 : i32
    %c0_i32_0 = arith.constant 0 : i32
    %c0_i32_1 = arith.constant 0 : i32
    return %c0_i32, %arg0, %c0_i32_0 : i32, i32, i32
  }
  func.func @transform_1(%arg0: i32) -> (i32, i32) {
    %c0_i32 = arith.constant 0 : i32
    %c0_i32_0 = arith.constant 0 : i32
    return %arg0, %c0_i32 : i32, i32
  }
}

</mosaic_0001>

<bundles_post_ra>
// kernel: tpu_custom_call.1
= control target key start
LH: loop header
LB: loop body
LE: loop exit
PB: predicated region body
PF: predicated region fallthrough
CT: control target
= control target key end

     0   :  { %6 = vsyncpa [#allocation3], 0  ;;  %s297_s0 = inlined_call_operand.hbm [shape: f32[2,160,128], index: 0, kind: input, shape index: {}]   ;;  %s298_s1 = inlined_call_operand.hbm [shape: f32[160,128], index: 1, kind: output, shape index: {}]  }
   0x1   :  { %7 = vsyncpa [#allocation4], 0  ;;  %s253_s6 = smov [#allocation2]   ;;  %s205_s10 = scalar_lea.hbm %s297_s0, 5120 }
   0x2   :  { %s13_s7 = sshll.u32 %s253_s6, 4  ;;  %p206_p0 = scmp.ne.s32.totalorder %s297_s0, %s205_s10  ;;  %s14_s7 = int_to_ptr.vmem [resolvable:$true] %s13_s7 }
   0x3   :  { %p209_p1 = scmp.lt.u32.totalorder %s205_s10, %s297_s0 }
   0x5   :  { %p211_p2 = pnand %p209_p1, %p206_p0 }
   0x7   :  { %214 = shalt.err (!%p211_p2)
}
   0x8   :  { %s215_s15 = scalar_lea.vmem %s14_s7, 5120  ;;  %p220_p4 = scmp.lt.s32.totalorder %s14_s7, %s14_s7 }
   0x9   :  { %p216_p3 = scmp.ne.s32.totalorder %s14_s7, %s215_s15  ;;  %p221_p5 = scmp.lt.s32.totalorder %s215_s15, %s215_s15 }
   0xb   :  { %p222_p6 = por %p221_p5, %p220_p4 }
   0xd   :  { %p223_p7 = pnand %p222_p6, %p216_p3 }
   0xf   :  { %226 = shalt.err (!%p223_p7)
}
  0x10   :  { %s254_s16 = smov 128   ;;  %s255_s17 = smov 8  }
  0x11   :  { %19 = dma.hbm_to_vmem [thread:$0]  %s297_s0, 5120, %s14_s7, [#allocation3], %s254_s16, %s254_s16, %s255_s17  }
  0x12   :  { %249 = dma.done.wait [#allocation3], 5120  }
  0x13   :  { %250 = vsyncadd [#allocation3], 4294962176  ;;  %v23_v0 = vld [vmem:[#allocation2] sm:$0xff]  ;;  %v24_v2 = vld [vmem:[#allocation2 + $0x8] sm:$0xff]  ;;  %s256_s0 = smov [#allocation5]  }
  0x14   :  { %v44_v1 = vld [vmem:[#allocation2 + $0xa0] sm:$0xff]  ;;  %v64_v3 = vmul.f32 %v23_v0, %v23_v0  ;;  %v45_v5 = vld [vmem:[#allocation2 + $0xa8] sm:$0xff]  ;;  %v65_v6 = vmul.f32 %v24_v2, %v24_v2  ;;  %v25_v7 = vld [vmem:[#allocation2 + $0x10] sm:$0xff]  ;;  %s189_s20 = sshll.u32 %s256_s0, 4  ;;  %s190_s20 = int_to_ptr.vmem [resolvable:$true] %s189_s20 }
  0x15   :  { %v104_v4 = vmul.f32 %v44_v1, %v44_v1  ;;  %v46_v8 = vld [vmem:[#allocation2 + $0xb0] sm:$0xff]  ;;  %v105_v9 = vmul.f32 %v45_v5, %v45_v5  ;;  %v66_v10 = vmul.f32 %v25_v7, %v25_v7  ;;  %v26_v12 = vld [vmem:[#allocation2 + $0x18] sm:$0xff]  ;;  %v27_v14 = vld [vmem:[#allocation2 + $0x20] sm:$0xff]  ;;  %s227_s21 = scalar_lea.vmem %s190_s20, 2560  ;;  %p232_p9 = scmp.lt.s32.totalorder %s190_s20, %s190_s20 }
  0x16   :  { %v106_v11 = vmul.f32 %v46_v8, %v46_v8  ;;  %v47_v13 = vld [vmem:[#allocation2 + $0xb8] sm:$0xff]  ;;  %v84_v15 = vsub.f32 1.0, %v64_v3  ;;  %v85_v17 = vsub.f32 1.0, %v65_v6  ;;  %v67_v18 = vmul.f32 %v26_v12, %v26_v12  ;;  %v48_v19 = vld [vmem:[#allocation2 + $0xc0] sm:$0xff]  ;;  %v28_v20 = vld [vmem:[#allocation2 + $0x28] sm:$0xff]  ;;  %p228_p8 = scmp.ne.s32.totalorder %s190_s20, %s227_s21  ;;  %p233_p10 = scmp.lt.s32.totalorder %s227_s21, %s227_s21 }
  0x17   :  { %v124_v16 = vsub.f32 1.0, %v104_v4  ;;  %v125_v21 = vsub.f32 1.0, %v105_v9  ;;  %v86_v22 = vsub.f32 1.0, %v66_v10  ;;  %v107_v24 = vmul.f32 %v47_v13, %v47_v13  ;;  %v49_v25 = vld [vmem:[#allocation2 + $0xc8] sm:$0xff]  ;;  %v29_v26 = vld [vmem:[#allocation2 + $0x30] sm:$0xff]  ;;  %v30_v32 = vld [vmem:[#allocation2 + $0x38] sm:$0xff] }
  0x18   :  { %v126_v23 = vsub.f32 1.0, %v106_v11  ;;  %v87_v28 = vsub.f32 1.0, %v67_v18  ;;  %v68_v29 = vmul.f32 %v27_v14, %v27_v14  ;;  %v108_v30 = vmul.f32 %v48_v19, %v48_v19  ;;  %v50_v31 = vld [vmem:[#allocation2 + $0xd0] sm:$0xff]  ;;  %v51_v37 = vld [vmem:[#allocation2 + $0xd8] sm:$0xff]  ;;  %v31_v42 = vld [vmem:[#allocation2 + $0x40] sm:$0xff]  ;;  %p234_p11 = por %p233_p10, %p232_p9 }
  0x19   :  { %v144_v27 = vmul.f32 %v124_v16, %v84_v15  ;;  %v145_v33 = vmul.f32 %v125_v21, %v85_v17  ;;  %v127_v35 = vsub.f32 1.0, %v107_v24  ;;  %v69_v36 = vmul.f32 %v28_v20, %v28_v20  ;;  %v52_v43 = vld [vmem:[#allocation2 + $0xe0] sm:$0xff]  ;;  %v32_v48 = vld [vmem:[#allocation2 + $0x48] sm:$0xff]  ;;  %v33_v54 = vld [vmem:[#allocation2 + $0x50] sm:$0xff] }
  0x1a   :  { %v146_v34 = vmul.f32 %v126_v23, %v86_v22  ;;  %v88_v38 = vsub.f32 1.0, %v68_v29  ;;  %v128_v39 = vsub.f32 1.0, %v108_v30  ;;  %v109_v40 = vmul.f32 %v49_v25, %v49_v25  ;;  %v53_v49 = vld [vmem:[#allocation2 + $0xe8] sm:$0xff]  ;;  %v54_v59 = vld [vmem:[#allocation2 + $0xf0] sm:$0xff]  ;;  %v34_v0 = vld [vmem:[#allocation2 + $0x58] sm:$0xff]  ;;  %p235_p12 = pnand %p234_p11, %p228_p8 }
  0x1b   :  { %164 = vst [vmem:[#allocation5] sm:$0xff] %v144_v27  ;;  %v70_v41 = vmul.f32 %v29_v26, %v29_v26  ;;  %165 = vst [vmem:[#allocation5 + $0x8] sm:$0xff] %v145_v33  ;;  %v147_v44 = vmul.f32 %v127_v35, %v87_v28  ;;  %v89_v45 = vsub.f32 1.0, %v69_v36  ;;  %v110_v46 = vmul.f32 %v50_v31, %v50_v31  ;;  %v55_v1 = vld [vmem:[#allocation2 + $0xf8] sm:$0xff]  ;;  %v35_v6 = vld [vmem:[#allocation2 + $0x60] sm:$0xff] }
  0x1c   :  { %166 = vst [vmem:[#allocation5 + $0x10] sm:$0xff] %v146_v34  ;;  %v71_v47 = vmul.f32 %v30_v32, %v30_v32  ;;  %v148_v50 = vmul.f32 %v128_v39, %v88_v38  ;;  %v129_v51 = vsub.f32 1.0, %v109_v40  ;;  %v111_v53 = vmul.f32 %v51_v37, %v51_v37  ;;  %v56_v7 = vld [vmem:[#allocation2 + $0x100] sm:$0xff]  ;;  %v36_v12 = vld [vmem:[#allocation2 + $0x68] sm:$0xff]  ;;  %v37_v18 = vld [vmem:[#allocation2 + $0x70] sm:$0xff] }
  0x1d   :  { %v90_v52 = vsub.f32 1.0, %v70_v41  ;;  %167 = vst [vmem:[#allocation5 + $0x18] sm:$0xff] %v147_v44  ;;  %v130_v55 = vsub.f32 1.0, %v110_v46  ;;  %v72_v57 = vmul.f32 %v31_v42, %v31_v42  ;;  %v112_v58 = vmul.f32 %v52_v43, %v52_v43  ;;  %v57_v13 = vld [vmem:[#allocation2 + $0x108] sm:$0xff]  ;;  %v58_v23 = vld [vmem:[#allocation2 + $0x110] sm:$0xff]  ;;  %v38_v28 = vld [vmem:[#allocation2 + $0x78] sm:$0xff] }
  0x1e   :  { %v91_v56 = vsub.f32 1.0, %v71_v47  ;;  %168 = vst [vmem:[#allocation5 + $0x20] sm:$0xff] %v148_v50  ;;  %v149_v60 = vmul.f32 %v129_v51, %v89_v45  ;;  %v131_v61 = vsub.f32 1.0, %v111_v53  ;;  %v73_v62 = vmul.f32 %v32_v48, %v32_v48  ;;  %v59_v29 = vld [vmem:[#allocation2 + $0x118] sm:$0xff]  ;;  %v39_v34 = vld [vmem:[#allocation2 + $0x80] sm:$0xff]  ;;  %v40_v40 = vld [vmem:[#allocation2 + $0x88] sm:$0xff] }
  0x1f   :  { %v113_v63 = vmul.f32 %v53_v49, %v53_v49  ;;  %v150_v2 = vmul.f32 %v130_v55, %v90_v52  ;;  %v92_v3 = vsub.f32 1.0, %v72_v57  ;;  %v132_v4 = vsub.f32 1.0, %v112_v58  ;;  %v60_v35 = vld [vmem:[#allocation2 + $0x120] sm:$0xff]  ;;  %v61_v41 = vld [vmem:[#allocation2 + $0x128] sm:$0xff]  ;;  %v41_v46 = vld [vmem:[#allocation2 + $0x90] sm:$0xff] }
  0x20   :  { %v74_v5 = vmul.f32 %v33_v54, %v33_v54  ;;  %169 = vst [vmem:[#allocation5 + $0x28] sm:$0xff] %v149_v60  ;;  %v151_v8 = vmul.f32 %v131_v61, %v91_v56  ;;  %v93_v9 = vsub.f32 1.0, %v73_v62  ;;  %v114_v11 = vmul.f32 %v54_v59, %v54_v59  ;;  %v62_v51 = vld [vmem:[#allocation2 + $0x130] sm:$0xff]  ;;  %v42_v56 = vld [vmem:[#allocation2 + $0x98] sm:$0xff] }
  0x21   :  { %v133_v10 = vsub.f32 1.0, %v113_v63  ;;  %170 = vst [vmem:[#allocation5 + $0x30] sm:$0xff] %v150_v2  ;;  %v152_v14 = vmul.f32 %v132_v4, %v92_v3  ;;  %v75_v16 = vmul.f32 %v34_v0, %v34_v0  ;;  %v115_v17 = vmul.f32 %v55_v1, %v55_v1  ;;  %v63_v57 = vld [vmem:[#allocation2 + $0x138] sm:$0xff] }
  0x22   :  { %v94_v15 = vsub.f32 1.0, %v74_v5  ;;  %171 = vst [vmem:[#allocation5 + $0x38] sm:$0xff] %v151_v8  ;;  %v134_v20 = vsub.f32 1.0, %v114_v11  ;;  %v76_v21 = vmul.f32 %v35_v6, %v35_v6  ;;  %v116_v22 = vmul.f32 %v56_v7, %v56_v7 }
  0x23   :  { %v153_v19 = vmul.f32 %v133_v10, %v93_v9  ;;  %172 = vst [vmem:[#allocation5 + $0x40] sm:$0xff] %v152_v14  ;;  %v95_v24 = vsub.f32 1.0, %v75_v16  ;;  %v135_v25 = vsub.f32 1.0, %v115_v17  ;;  %v77_v26 = vmul.f32 %v36_v12, %v36_v12 }
  0x24   :  { %v117_v27 = vmul.f32 %v57_v13, %v57_v13  ;;  %v154_v30 = vmul.f32 %v134_v20, %v94_v15  ;;  %v96_v31 = vsub.f32 1.0, %v76_v21  ;;  %v136_v32 = vsub.f32 1.0, %v116_v22 }
  0x25   :  { %173 = vst [vmem:[#allocation5 + $0x48] sm:$0xff] %v153_v19  ;;  %v78_v33 = vmul.f32 %v37_v18, %v37_v18  ;;  %v155_v36 = vmul.f32 %v135_v25, %v95_v24  ;;  %v97_v37 = vsub.f32 1.0, %v77_v26  ;;  %v118_v39 = vmul.f32 %v58_v23, %v58_v23 }
  0x26   :  { %v137_v38 = vsub.f32 1.0, %v117_v27  ;;  %174 = vst [vmem:[#allocation5 + $0x50] sm:$0xff] %v154_v30  ;;  %v156_v42 = vmul.f32 %v136_v32, %v96_v31  ;;  %v79_v44 = vmul.f32 %v38_v28, %v38_v28  ;;  %v119_v45 = vmul.f32 %v59_v29, %v59_v29 }
  0x27   :  { %v98_v43 = vsub.f32 1.0, %v78_v33  ;;  %175 = vst [vmem:[#allocation5 + $0x58] sm:$0xff] %v155_v36  ;;  %v138_v48 = vsub.f32 1.0, %v118_v39  ;;  %v80_v49 = vmul.f32 %v39_v34, %v39_v34  ;;  %v120_v50 = vmul.f32 %v60_v35, %v60_v35 }
  0x28   :  { %v157_v47 = vmul.f32 %v137_v38, %v97_v37  ;;  %176 = vst [vmem:[#allocation5 + $0x60] sm:$0xff] %v156_v42  ;;  %v99_v52 = vsub.f32 1.0, %v79_v44  ;;  %v139_v53 = vsub.f32 1.0, %v119_v45  ;;  %v81_v54 = vmul.f32 %v40_v40, %v40_v40 }
  0x29   :  { %v121_v55 = vmul.f32 %v61_v41, %v61_v41  ;;  %v158_v58 = vmul.f32 %v138_v48, %v98_v43  ;;  %v100_v59 = vsub.f32 1.0, %v80_v49  ;;  %v140_v60 = vsub.f32 1.0, %v120_v50 }
  0x2a   :  { %177 = vst [vmem:[#allocation5 + $0x68] sm:$0xff] %v157_v47  ;;  %v82_v61 = vmul.f32 %v41_v46, %v41_v46  ;;  %v159_v62 = vmul.f32 %v139_v53, %v99_v52  ;;  %v101_v63 = vsub.f32 1.0, %v81_v54  ;;  %v122_v1 = vmul.f32 %v62_v51, %v62_v51 }
  0x2b   :  { %v141_v0 = vsub.f32 1.0, %v121_v55  ;;  %178 = vst [vmem:[#allocation5 + $0x70] sm:$0xff] %v158_v58  ;;  %v160_v2 = vmul.f32 %v140_v60, %v100_v59  ;;  %v83_v4 = vmul.f32 %v42_v56, %v42_v56  ;;  %v123_v5 = vmul.f32 %v63_v57, %v63_v57 }
  0x2c   :  { %v102_v3 = vsub.f32 1.0, %v82_v61  ;;  %179 = vst [vmem:[#allocation5 + $0x78] sm:$0xff] %v159_v62  ;;  %v142_v7 = vsub.f32 1.0, %v122_v1 }
  0x2d   :  { %v161_v6 = vmul.f32 %v141_v0, %v101_v63  ;;  %180 = vst [vmem:[#allocation5 + $0x80] sm:$0xff] %v160_v2  ;;  %v103_v8 = vsub.f32 1.0, %v83_v4  ;;  %v143_v9 = vsub.f32 1.0, %v123_v5 }
  0x2e   :  { %v162_v10 = vmul.f32 %v142_v7, %v102_v3 }
  0x2f   :  { %181 = vst [vmem:[#allocation5 + $0x88] sm:$0xff] %v161_v6  ;;  %v163_v11 = vmul.f32 %v143_v9, %v103_v8 }
  0x30   :  { %182 = vst [vmem:[#allocation5 + $0x90] sm:$0xff] %v162_v10 }
  0x31   :  { %183 = vst [vmem:[#allocation5 + $0x98] sm:$0xff] %v163_v11 }
  0x32   :  { %238 = shalt.err (!%p235_p12)
}
  0x33   :  { %s239_s24 = scalar_lea.hbm %s298_s1, 2560 }
  0x34   :  { %p240_p13 = scmp.ne.s32.totalorder %s298_s1, %s239_s24  ;;  %p243_p0 = scmp.lt.u32.totalorder %s239_s24, %s298_s1 }
  0x36   :  { %p245_p1 = pnand %p243_p0, %p240_p13 }
  0x38   :  { %248 = shalt.err (!%p245_p1)
}
  0x39   :  { %195 = dma.vmem_to_hbm [thread:$0]  %s190_s20, 2560, %s298_s1, [#allocation4], %s254_s16, %s254_s16, %s255_s17  }
  0x3a   :  { %251 = dma.done.wait [#allocation4], 2560  }
  0x3b   :  { %252 = vsyncadd [#allocation4], 4294964736 }
  0x3c   :  { %199 = vsyncpa [#allocation3], 1 }
  0x3d   :  { %200 = vsyncpa [#allocation4], 1 }

</bundles_post_ra>
